<compile_context>
chip_gen: v6e
topology: v6e:2x2x1
jax: 0.10.0
libtpu: 0.0.40
codegen_flags: <defaults>
</compile_context>

<pallas_src>
import functools

import jax
import jax.numpy as jnp
from jax.experimental import pallas as pl
from jax.experimental.pallas import tpu as pltpu
import numpy as np


_SENTINEL = 1e30  # finite, so (excluded - excluded) stays finite and relu clamps to 0


def _hinge_calibrated_ranking_kernel(x_ref, t_ref, loss_ref, *, chunk):
    # x_ref, t_ref: [TB, C] blocks; loss_ref: [TB, 1] per-row loss.
    x = x_ref[...].astype(jnp.float32)              # [TB, C]
    t = t_ref[...]                                  # native dtype (binary labels)

    # Faithful to torch: positive mask = (t != 0), negative mask = (t != 1).
    pos_b = (t != 0)
    neg_b = (t != 1)
    pos = pos_b.astype(jnp.float32)                 # [TB, C]
    neg = neg_b.astype(jnp.float32)                 # [TB, C]

    n_pos = jnp.sum(pos, axis=-1, keepdims=True)    # [TB, 1]
    n_neg = jnp.sum(neg, axis=-1, keepdims=True)    # [TB, 1]

    # Calibration terms (masked means).
    pos_sum = jnp.sum(jnp.maximum(1.0 - x, 0.0) * pos, axis=-1, keepdims=True)
    neg_sum = jnp.sum(jnp.maximum(1.0 + x, 0.0) * neg, axis=-1, keepdims=True)
    pos_calib = jnp.where(n_pos > 0.0, pos_sum / jnp.maximum(n_pos, 1.0), 0.0)
    neg_calib = jnp.where(n_neg > 0.0, neg_sum / jnp.maximum(n_neg, 1.0), 0.0)

    # Pairwise ranking hinge via sentinel masking (VPU sub/max + lane reductions; no MXU,
    # no column-layout DMA).  Elements excluded by either mask reduce to exactly 0.
    xc1 = jnp.where(neg_b, 1.0 + x, -_SENTINEL)     # [TB, C]  (negative-axis operand)
    xrm = jnp.where(pos_b, x, _SENTINEL)            # [TB, C]  (positive-axis operand)
    xrm_row = xrm[:, None, :]                       # [TB, 1, C]

    tb, c = x.shape
    pair_sum = jnp.zeros((tb, 1), jnp.float32)
    # Chunk the negative (sublane) axis so the live [TB, cj, C] slab stays bounded.
    for j0 in range(0, c, chunk):
        cj = min(chunk, c - j0)
        # Column form of this j-chunk, built in-kernel (tiny XLU transpose).
        col = jnp.transpose(xc1[:, None, j0:j0 + cj], (0, 2, 1))     # [TB, cj, 1]
        d = jnp.maximum(col - xrm_row, 0.0)                          # [TB, cj, C]
        pair_sum = pair_sum + jnp.sum(jnp.sum(d, axis=2), axis=1, keepdims=True)

    n_pair = n_neg * n_pos
    # Empty-set fallbacks match the torch scalar-0.0 substitution exactly.
    l_hinge = jnp.where(
        n_pair > 0.0,
        pair_sum / jnp.maximum(n_pair, 1.0),
        jnp.where(n_neg > 0.0, neg_calib,
                  jnp.where(n_pos > 0.0, pos_calib, 1.0)),
    )

    loss_ref[...] = l_hinge + neg_calib + pos_calib                   # [TB, 1]


def _vmem_policy():
    """(per_tile_budget_bytes, vmem_limit_bytes), generation-aware."""
    try:
        phys = int(pltpu.get_tpu_info().vmem_capacity_bytes)
    except Exception:
        phys = 64 * 1024 * 1024  # assume the smallest generation (v7x)
    if phys >= 100 * 1024 * 1024:            # v5e / v6e: 128 MiB physical VMEM
        return 12 * 1024 * 1024, 80 * 1024 * 1024
    return 6 * 1024 * 1024, 40 * 1024 * 1024  # v7x: 64 MiB physical VMEM


def _default_tile_b(C, chunk, budget_bytes):
    """Count ALL per-row VMEM users, not just the pairwise slab."""
    c_lane = ((C + 127) // 128) * 128
    cj_sub = ((chunk + 7) // 8) * 8
    per_row = (
        4 * 4 * c_lane                      # x, t input blocks, double-buffered (f32 bound)
        + 6 * 4 * c_lane                    # row-form temporaries (masks, sentinels, calib)
        + (3 * 4 * cj_sub * c_lane) // 2    # live [*, cj, C] pairwise chunk (+50% headroom)
    )
    return max(1, min(256, budget_bytes // per_row))


def hinge_calibrated_ranking(outputs, targets, *, tile_b=None, chunk=None, interpret=False):
    """outputs, targets: [B, C]. Returns scalar mean loss (float32)."""
    B, C = outputs.shape

    if chunk is None:
        chunk = min(C, 256)
    chunk = max(1, min(int(chunk), C))

    budget, vmem_limit = _vmem_policy()
    if tile_b is None:
        tile_b = _default_tile_b(C, chunk, budget)
    tile_b = max(1, min(int(tile_b), B))

    # Keep >= 2 grid tiles when the batch allows it: both v7x TensorCores get work
    # (the extra grid step is negligible on single-TC v5e/v6e).
    if B >= 2:
        tile_b = min(tile_b, pl.cdiv(B, 2))
    if tile_b < B:
        # Multi-tile: the (tile_b, C) block's sublane dim must be a multiple of 8.
        tile_b = max(8, (tile_b // 8) * 8)
        if tile_b >= B:
            tile_b = B  # fall back to one full-batch tile (block == full array dims)
    n_tiles = pl.cdiv(B, tile_b)
    b_pad = n_tiles * tile_b

    if b_pad != B:
        pad = ((0, b_pad - B), (0, 0))
        outputs_p = jnp.pad(outputs, pad)
        targets_p = jnp.pad(targets, pad)
    else:
        outputs_p, targets_p = outputs, targets

    kernel = functools.partial(_hinge_calibrated_ranking_kernel, chunk=chunk)

    per_row = pl.pallas_call(
        kernel,
        out_shape=jax.ShapeDtypeStruct((b_pad, 1), jnp.float32),
        grid=(n_tiles,),
        in_specs=[
            pl.BlockSpec((tile_b, C), lambda i: (i, 0)),
            pl.BlockSpec((tile_b, C), lambda i: (i, 0)),
        ],
        out_specs=pl.BlockSpec((tile_b, 1), lambda i: (i, 0)),
        compiler_params=pltpu.CompilerParams(
            dimension_semantics=("parallel",),
            vmem_limit_bytes=vmem_limit,
        ),
        interpret=interpret,
    )(outputs_p, targets_p)

    # Final mean over the real rows only (padded rows sliced away in the wrapper).
    return jnp.mean(per_row[:B, 0])


def _reference_loss(outputs, targets):
    # Direct numpy translation of the PyTorch forward (dynamic masking).
    outputs = np.asarray(outputs, dtype=np.float64)
    targets = np.asarray(targets)
    losses = []
    for i in range(outputs.shape[0]):
        o = outputs[i]
        pos_mask = targets[i] != 0
        neg_mask = (1 - targets[i]) != 0
        positive = o[pos_mask]
        negative = o[neg_mask]
        if negative.size != 0:
            neg_calib = np.maximum(1.0 + negative, 0.0).mean()
        else:
            neg_calib = 0.0
            negative = np.array(0.0)
        if positive.size != 0:
            pos_calib = np.maximum(1.0 - positive, 0.0).mean()
        else:
            pos_calib = 0.0
            positive = np.array(0.0)
        hinge = 1.0 + negative[..., None] - positive
        l_hinge = np.maximum(hinge, 0.0).mean()
        losses.append(l_hinge + neg_calib + pos_calib)
    return float(np.mean(losses))


if __name__ == "__main__":
    B, C = 12, 10
    key = jax.random.PRNGKey(0)
    k1, k2 = jax.random.split(key)
    outputs = jax.random.normal(k1, (B, C), dtype=jnp.float32)
    targets = (jax.random.uniform(k2, (B, C)) > 0.5).astype(jnp.float32)
    targets = targets.at[1].set(1.0)  # all-positive row (empty-negatives branch)
    targets = targets.at[2].set(0.0)  # all-negative row (empty-positives branch)

    # Default heuristic with B=12 yields tile_b=8 -> 2 grid tiles + batch padding path.
    loss = hinge_calibrated_ranking(outputs, targets)
    loss = jax.block_until_ready(loss)

    ref = _reference_loss(np.asarray(outputs), np.asarray(targets))
    assert np.allclose(float(loss), ref, rtol=1e-5, atol=1e-5), (float(loss), ref)
    print("KERNEL_OK")
</pallas_src>

<mosaic_0001>
module attributes {stable_mosaic.version = 11 : i64} {
  func.func @_hinge_calibrated_ranking_kernel(%arg0: i32, %arg1: memref<8x10xf32, #tpu.memory_space<vmem>>, %arg2: memref<8x10xf32, #tpu.memory_space<vmem>>, %arg3: memref<8x1xf32, #tpu.memory_space<vmem>>) attributes {dimension_semantics = [#tpu.dimension_semantics<parallel>], iteration_bounds = array<i64: 2>, scalar_prefetch = 0 : i64, scratch_operands = 0 : i64, tpu.core_type = #tpu.core_type<tc>, window_params = [{transform_indices = @transform_0, window_bounds = array<i64: 8, 10>}, {transform_indices = @transform_1, window_bounds = array<i64: 8, 10>}, {transform_indices = @transform_2, window_bounds = array<i64: 8, 1>}]} {
    %c0 = arith.constant 0 : index
    %c0_0 = arith.constant 0 : index
    %0 = vector.load %arg1[%c0, %c0_0] : memref<8x10xf32, #tpu.memory_space<vmem>>, vector<8x10xf32>
    %c0_1 = arith.constant 0 : index
    %c0_2 = arith.constant 0 : index
    %1 = vector.load %arg2[%c0_1, %c0_2] : memref<8x10xf32, #tpu.memory_space<vmem>>, vector<8x10xf32>
    %cst = arith.constant 0.000000e+00 : f32
    %2 = vector.broadcast %cst : f32 to vector<8x10xf32>
    %3 = arith.cmpf one, %1, %2 : vector<8x10xf32>
    %cst_3 = arith.constant 1.000000e+00 : f32
    %4 = vector.broadcast %cst_3 : f32 to vector<8x10xf32>
    %5 = arith.cmpf one, %1, %4 : vector<8x10xf32>
    %6 = arith.extui %3 : vector<8x10xi1> to vector<8x10xi32>
    %7 = arith.sitofp %6 : vector<8x10xi32> to vector<8x10xf32>
    %8 = arith.extui %5 : vector<8x10xi1> to vector<8x10xi32>
    %9 = arith.sitofp %8 : vector<8x10xi32> to vector<8x10xf32>
    %cst_4 = arith.constant dense<0.000000e+00> : vector<8xf32>
    %10 = vector.multi_reduction <add>, %7, %cst_4 [1] : vector<8x10xf32> to vector<8xf32>
    %11 = vector.shape_cast %10 : vector<8xf32> to vector<8x1xf32>
    %cst_5 = arith.constant dense<0.000000e+00> : vector<8xf32>
    %12 = vector.multi_reduction <add>, %9, %cst_5 [1] : vector<8x10xf32> to vector<8xf32>
    %13 = vector.shape_cast %12 : vector<8xf32> to vector<8x1xf32>
    %cst_6 = arith.constant 1.000000e+00 : f32
    %14 = vector.broadcast %cst_6 : f32 to vector<8x10xf32>
    %15 = arith.subf %14, %0 : vector<8x10xf32>
    %cst_7 = arith.constant 0.000000e+00 : f32
    %16 = vector.broadcast %cst_7 : f32 to vector<8x10xf32>
    %17 = arith.maximumf %15, %16 : vector<8x10xf32>
    %18 = arith.mulf %17, %7 : vector<8x10xf32>
    %cst_8 = arith.constant dense<0.000000e+00> : vector<8xf32>
    %19 = vector.multi_reduction <add>, %18, %cst_8 [1] : vector<8x10xf32> to vector<8xf32>
    %20 = vector.shape_cast %19 : vector<8xf32> to vector<8x1xf32>
    %cst_9 = arith.constant 1.000000e+00 : f32
    %21 = vector.broadcast %cst_9 : f32 to vector<8x10xf32>
    %22 = arith.addf %21, %0 : vector<8x10xf32>
    %cst_10 = arith.constant 0.000000e+00 : f32
    %23 = vector.broadcast %cst_10 : f32 to vector<8x10xf32>
    %24 = arith.maximumf %22, %23 : vector<8x10xf32>
    %25 = arith.mulf %24, %9 : vector<8x10xf32>
    %cst_11 = arith.constant dense<0.000000e+00> : vector<8xf32>
    %26 = vector.multi_reduction <add>, %25, %cst_11 [1] : vector<8x10xf32> to vector<8xf32>
    %27 = vector.shape_cast %26 : vector<8xf32> to vector<8x1xf32>
    %cst_12 = arith.constant 0.000000e+00 : f32
    %28 = vector.broadcast %cst_12 : f32 to vector<8x1xf32>
    %29 = arith.cmpf ogt, %11, %28 : vector<8x1xf32>
    %cst_13 = arith.constant 1.000000e+00 : f32
    %30 = vector.broadcast %cst_13 : f32 to vector<8x1xf32>
    %31 = arith.maximumf %11, %30 : vector<8x1xf32>
    %32 = arith.divf %20, %31 : vector<8x1xf32>
    %cst_14 = arith.constant 0.000000e+00 : f32
    %33 = vector.broadcast %cst_14 : f32 to vector<8x1xf32>
    %34 = arith.select %29, %32, %33 : vector<8x1xi1>, vector<8x1xf32>
    %cst_15 = arith.constant 0.000000e+00 : f32
    %35 = vector.broadcast %cst_15 : f32 to vector<8x1xf32>
    %36 = arith.cmpf ogt, %13, %35 : vector<8x1xf32>
    %cst_16 = arith.constant 1.000000e+00 : f32
    %37 = vector.broadcast %cst_16 : f32 to vector<8x1xf32>
    %38 = arith.maximumf %13, %37 : vector<8x1xf32>
    %39 = arith.divf %27, %38 : vector<8x1xf32>
    %cst_17 = arith.constant 0.000000e+00 : f32
    %40 = vector.broadcast %cst_17 : f32 to vector<8x1xf32>
    %41 = arith.select %36, %39, %40 : vector<8x1xi1>, vector<8x1xf32>
    %cst_18 = arith.constant 1.000000e+00 : f32
    %42 = vector.broadcast %cst_18 : f32 to vector<8x10xf32>
    %43 = arith.addf %42, %0 : vector<8x10xf32>
    %cst_19 = arith.constant -1.000000e+30 : f32
    %44 = vector.broadcast %cst_19 : f32 to vector<8x10xf32>
    %45 = arith.select %5, %43, %44 : vector<8x10xi1>, vector<8x10xf32>
    %cst_20 = arith.constant 1.000000e+30 : f32
    %46 = vector.broadcast %cst_20 : f32 to vector<8x10xf32>
    %47 = arith.select %3, %0, %46 : vector<8x10xi1>, vector<8x10xf32>
    %48 = vector.shape_cast %47 : vector<8x10xf32> to vector<8x1x10xf32>
    %cst_21 = arith.constant 0.000000e+00 : f32
    %49 = vector.broadcast %cst_21 : f32 to vector<8x1xf32>
    %50 = vector.shape_cast %45 : vector<8x10xf32> to vector<8x1x10xf32>
    %51 = tpu.transpose %50, [0, 2, 1] : vector<8x1x10xf32> -> vector<8x10x1xf32>
    %52 = vector.broadcast %51 : vector<8x10x1xf32> to vector<8x10x10xf32>
    %53 = vector.broadcast %48 : vector<8x1x10xf32> to vector<8x10x10xf32>
    %54 = arith.subf %52, %53 : vector<8x10x10xf32>
    %cst_22 = arith.constant 0.000000e+00 : f32
    %55 = vector.broadcast %cst_22 : f32 to vector<8x10x10xf32>
    %56 = arith.maximumf %54, %55 : vector<8x10x10xf32>
    %cst_23 = arith.constant dense<0.000000e+00> : vector<8x10xf32>
    %57 = vector.multi_reduction <add>, %56, %cst_23 [2] : vector<8x10x10xf32> to vector<8x10xf32>
    %cst_24 = arith.constant dense<0.000000e+00> : vector<8xf32>
    %58 = vector.multi_reduction <add>, %57, %cst_24 [1] : vector<8x10xf32> to vector<8xf32>
    %59 = vector.shape_cast %58 : vector<8xf32> to vector<8x1xf32>
    %60 = arith.addf %49, %59 : vector<8x1xf32>
    %61 = arith.mulf %13, %11 : vector<8x1xf32>
    %cst_25 = arith.constant 0.000000e+00 : f32
    %62 = vector.broadcast %cst_25 : f32 to vector<8x1xf32>
    %63 = arith.cmpf ogt, %61, %62 : vector<8x1xf32>
    %cst_26 = arith.constant 1.000000e+00 : f32
    %64 = vector.broadcast %cst_26 : f32 to vector<8x1xf32>
    %65 = arith.maximumf %61, %64 : vector<8x1xf32>
    %66 = arith.divf %60, %65 : vector<8x1xf32>
    %cst_27 = arith.constant 0.000000e+00 : f32
    %67 = vector.broadcast %cst_27 : f32 to vector<8x1xf32>
    %68 = arith.cmpf ogt, %13, %67 : vector<8x1xf32>
    %cst_28 = arith.constant 0.000000e+00 : f32
    %69 = vector.broadcast %cst_28 : f32 to vector<8x1xf32>
    %70 = arith.cmpf ogt, %11, %69 : vector<8x1xf32>
    %cst_29 = arith.constant 1.000000e+00 : f32
    %71 = vector.broadcast %cst_29 : f32 to vector<8x1xf32>
    %72 = arith.select %70, %34, %71 : vector<8x1xi1>, vector<8x1xf32>
    %73 = arith.select %68, %41, %72 : vector<8x1xi1>, vector<8x1xf32>
    %74 = arith.select %63, %66, %73 : vector<8x1xi1>, vector<8x1xf32>
    %75 = arith.addf %74, %41 : vector<8x1xf32>
    %76 = arith.addf %75, %34 : vector<8x1xf32>
    %c0_30 = arith.constant 0 : index
    %c0_31 = arith.constant 0 : index
    %77 = vector.load %arg3[%c0_30, %c0_31] : memref<8x1xf32, #tpu.memory_space<vmem>>, vector<8x1xf32>
    tpu.vector_store %arg3[%c0_30, %c0_31], %76 {strides = array<i32>} : memref<8x1xf32, #tpu.memory_space<vmem>>, vector<8x1xf32>,
    return
  }
  func.func @transform_0(%arg0: i32) -> (i32, i32) {
    %c0_i32 = arith.constant 0 : i32
    %c0_i32_0 = arith.constant 0 : i32
    return %arg0, %c0_i32 : i32, i32
  }
  func.func @transform_1(%arg0: i32) -> (i32, i32) {
    %c0_i32 = arith.constant 0 : i32
    %c0_i32_0 = arith.constant 0 : i32
    return %arg0, %c0_i32 : i32, i32
  }
  func.func @transform_2(%arg0: i32) -> (i32, i32) {
    %c0_i32 = arith.constant 0 : i32
    %c0_i32_0 = arith.constant 0 : i32
    return %arg0, %c0_i32 : i32, i32
  }
}

</mosaic_0001>

<bundles_post_ra>
// kernel: tpu_custom_call.1
= control target key start
LH: loop header
LB: loop body
LE: loop exit
PB: predicated region body
PF: predicated region fallthrough
CT: control target
= control target key end

     0   :  { %7 = vsyncpa [#allocation3], 0  ;;  %s1431_s0 = inlined_call_operand.hbm [shape: f32[16,10], index: 0, kind: input, shape index: {}]   ;;  %s1432_s1 = inlined_call_operand.hbm [shape: f32[16,10], index: 1, kind: input, shape index: {}]   ;;  %s1433_s2 = inlined_call_operand.vmem [shape: f32[16,1], index: 2, kind: output, shape index: {}]  }
   0x1   :  { %9 = vsyncpa [#allocation3 + $0x1], 0 }
   0x2   :  { %10 = vsyncpa [#allocation5], 0 }
   0x3   :  { %12 = vsyncpa [#allocation5 + $0x1], 0  ;;  %s1197_s9 = smov 0   ;;  %s1199_s10 = smov 0  }
   0x4   :  { %s1201_s11 = smov 0   ;;  %s1203_s12 = smov 0  }
   0x5 LB: > { %s1216_s13 = sadd.s32 4294967295, %s1175_s12   ;;  %s1219_s14 = sadd.s32 1, %s1175_s12   ;;  %s1175_s12 = sphi %s1203_s12, %s1445_s12   ;;  %s1171_s11 = sphi %s1201_s11, %s1444_s11   ;;  %s1167_s10 = sphi %s1199_s10, %s1443_s10   ;;  %s1163_s9 = sphi %s1197_s9, %s1442_s9  }
   0x6   : > { %s22_s15 = ssub.s32 %s1175_s12, %s1219_s14  ;;  %s25_s16 = sadd.s32 1, %s1171_s11 }
   0x7   : > { %p23_p0 = scmp.eq.s32.totalorder %s22_s15, 0  ;;  %p32_p1 = scmp.ne.s32.totalorder %s1171_s11, %s1167_s10 }
   0x8   : > { %p33_p2 = scmp.eq.s32.totalorder %s1175_s12, 0  ;;  %p38_p3 = scmp.ne.s32.totalorder %s1167_s10, %s1163_s9 }
   0x9   : > { %s1229_s17 = scalar_select %p23_p0, %s1171_s11, %s25_s16  }
   0xa   : > { %p34_p4 = por %p33_p2, %p32_p1  ;;  %p39_p5 = scmp.eq.s32.totalorder %s1216_s13, 0 }
   0xb   : > { %p1037_p6 = scmp.lt.s32.totalorder %s1175_s12, 2  ;;  %s1238_s19 = sand.u32 1, %s1171_s11  }
   0xc   : > { %p1233_p7 = por %p39_p5, %p38_p3  ;;  %s1014_s20 = sshll.u32 %s1238_s19, 3 }
   0xd   : > { %s1015_s21 = sshll.u32 %s1175_s12, 7  ;;  %s118_s25 = scalar_lea.vmem [#allocation2], %s1014_s20 }
   0xe   : > { %s1435_s18 = scalar_select %p1233_p7, 1, 0 }
   0xf   : > { %s1247_s24 = scalar_lea.hbm %s1431_s0, %s1015_s21  ;;  %s125_s26 = sshll.u32 %s118_s25, 4  ;;  %s1251_s26 = int_to_ptr.vmem [resolvable:$true] %s125_s26 }
  0x10   : > { %p1253_p8 = pnand %p1037_p6, %p34_p4  ;;  %s115_s28 = scalar_lea.sflag [#allocation3], %s1238_s19 }
  0x11   : > { %s1081_s29 = scalar_lea.hbm %s1247_s24, 128  ;;  %s1086_s4 = scalar_lea.hbm %s1431_s0, 256 }
  0x12   : > { %p1082_p11 = scmp.ne.s32.totalorder %s1247_s24, %s1081_s29  ;;  %p1083_p12 = pneg %p1253_p8 }
  0x13   : > { %p1087_p1 = scmp.lt.s32.totalorder %s1247_s24, %s1431_s0  ;;  %p1088_p2 = scmp.lt.s32.totalorder %s1086_s4, %s1081_s29 }
  0x14   : > { %p1084_p13 = pnand %p1083_p12, %p1082_p11 }
  0x15   : > { %p1089_p3 = por %p1088_p2, %p1087_p1 }
  0x16   : > { %p1085_p0 = pneg %p1084_p13 }
  0x18   : > { %p1090_p4 = pnand %p1089_p3, %p1085_p0 }
  0x1a   : > { %1093 = shalt.err (!%p1090_p4)
}
  0x1b   : > { %s1094_s7 = scalar_lea.vmem %s1251_s26, 128  ;;  %s1177_s8 = smov [#allocation2]  }
  0x1c   : > { %p1095_p5 = scmp.ne.s32.totalorder %s1251_s26, %s1094_s7  ;;  %s1099_s9 = sshll.u32 %s1177_s8, 4  ;;  %s1100_s9 = int_to_ptr.vmem [resolvable:$false] %s1099_s9 }
  0x1d   : > { %s1101_s15 = scalar_lea.vmem %s1100_s9, 256  ;;  %p1102_p13 = scmp.lt.s32.totalorder %s1251_s26, %s1100_s9 }
  0x1e   : > { %p1097_p6 = pnand %p1095_p5, %p1083_p12  ;;  %p1103_p9 = scmp.lt.s32.totalorder %s1101_s15, %s1094_s7 }
  0x20   : > { %p1098_p11 = pneg %p1097_p6  ;;  %p1104_p10 = por %p1103_p9, %p1102_p13 }
  0x22   : > { %p1105_p1 = pnand %p1104_p10, %p1098_p11 }
  0x24   : > { %1108 = shalt.err (!%p1105_p1)
}
  0x25   : > { %1033 = dma.hbm_to_vmem [thread:$0]  (!%p1253_p8), %s1247_s24, 128, %s1251_s26, %s115_s28  }
  0x26   : > { %p1437_p0 = scmp.lt.s32.totalorder %s1175_s12, 3  ;;  %p1438_p2 = scmp.ge.s32.totalorder %s1175_s12, 1 }
  0x27   : > { %s1297_s25 = scalar_lea.hbm %s1432_s1, %s1015_s21  ;;  %s136_s29 = scalar_lea.vmem [#allocation4], %s1014_s20 }
  0x28   : > { %p1288_p3 = pnand %p1438_p2, %p1437_p0  ;;  %s143_s30 = sshll.u32 %s136_s29, 4  ;;  %s144_s30 = int_to_ptr.vmem [resolvable:$true] %s143_s30 }
  0x29   : > { %s133_s24 = scalar_lea.sflag [#allocation5], %s1238_s19  ;;  %s1109_s26 = scalar_lea.hbm %s1297_s25, 128 }
  0x2a   : > { %s1439_s16 = scalar_select %p1288_p3, 1, 0 }
  0x2b   : > { %p1110_p9 = scmp.ne.s32.totalorder %s1297_s25, %s1109_s26  ;;  %s1114_s3 = scalar_lea.hbm %s1432_s1, 256 }
  0x2c   : > { %p1115_p5 = scmp.lt.s32.totalorder %s1297_s25, %s1432_s1  ;;  %p1116_p6 = scmp.lt.s32.totalorder %s1114_s3, %s1109_s26 }
  0x2d   : > { %p1112_p10 = pnand %p1110_p9, %p1083_p12 }
  0x2e   : > { %p1117_p11 = por %p1116_p6, %p1115_p5 }
  0x2f   : > { %p1113_p4 = pneg %p1112_p10 }
  0x31   : > { %p1118_p13 = pnand %p1117_p11, %p1113_p4 }
  0x33   : > { %1121 = shalt.err (!%p1118_p13)
}
  0x34   : > { %s1122_s20 = scalar_lea.vmem %s144_s30, 128  ;;  %s1178_s19 = smov [#allocation4]  }
  0x35   : > { %p1123_p1 = scmp.ne.s32.totalorder %s144_s30, %s1122_s20  ;;  %s1127_s5 = sshll.u32 %s1178_s19, 4  ;;  %s1128_s5 = int_to_ptr.vmem [resolvable:$false] %s1127_s5 }
  0x36   : > { %s1129_s6 = scalar_lea.vmem %s1128_s5, 256  ;;  %p1130_p9 = scmp.lt.s32.totalorder %s144_s30, %s1128_s5 }
  0x37   : > { %p1125_p0 = pnand %p1123_p1, %p1083_p12  ;;  %p1131_p10 = scmp.lt.s32.totalorder %s1129_s6, %s1122_s20 }
  0x39   : > { %p1126_p2 = pneg %p1125_p0  ;;  %p1132_p7 = por %p1131_p10, %p1130_p9 }
  0x3b   : > { %p1133_p3 = pnand %p1132_p7, %p1126_p2 }
  0x3d   : > { %1136 = shalt.err (!%p1133_p3)
}
  0x3e   : > { %1036 = dma.hbm_to_vmem [thread:$0]  (!%p1253_p8), %s1297_s25, 128, %s144_s30, %s133_s24  }
  0x3f   : > { %p1440_p4 = scmp.ne.s32.totalorder %s1439_s16, 0 }
  0x40   : > { %s154_s7 = sand.u32 (!%p1440_p4), 1, %s1167_s10   ;;  %p1441_p12 = scmp.ne.s32.totalorder (!%p1440_p4), %s1435_s18, 0 }
  0x41   : > { %152 = sbr.rel (%p1440_p4) target bundleno = 683 (0x2ab), region = 28  ;;  %s1019_s8 = sshll.u32 (!%p1440_p4), %s154_s7, 3 }
  0x42   : > { %s155_s9 = scalar_lea.sflag (!%p1440_p4), [#allocation3], %s154_s7  ;;  %s158_s15 = scalar_lea.vmem (!%p1440_p4), [#allocation2], %s1019_s8 }
  0x46   : > { %1154 = dma.done.wait (%p1441_p12), %s155_s9, 128  }
  0x47   : > { %1156 = vsyncadd (%p1441_p12), %s155_s9, 4294967168  ;;  %s164_s22 = scalar_lea.sflag [#allocation5], %s154_s7  ;;  %s167_s23 = scalar_lea.vmem [#allocation4], %s1019_s8 }
  0x48   : > { %1158 = dma.done.wait (%p1441_p12), %s164_s22, 128  }
  0x49   : > { %1160 = vsyncadd (%p1441_p12), %s164_s22, 4294967168  ;;  %v240_v0 = vlaneseq  ;;  %v1179_v1 = vmov 1966171168   ;;  %v1334_v5 = vld [vmem:[%s158_s15] sm:$0xff]  ;;  %v1336_v6 = vld [vmem:[%s167_s23] sm:$0xff]  ;;  %v1180_v23 = vmov 0  }
  0x4a   : > { %v238_v2 = vunpack.c.l.s4 %v1179_v1  ;;  %vm199_vm0 = vcmp.ne.f32.partialorder %v1336_v6, 1.0  ;;  %v1343_v8 = vadd.f32 1.0, %v1334_v5  ;;  %vm198_vm1 = vcmp.ne.f32.partialorder %v1336_v6, 0.0  ;;  %p192_p7 = scmp.lt.s32.totalorder %s1216_s13, 1 }
  0x4b   : > { %v1332_v4 = vshrl.u32 %v240_v0, 7  ;;  %v234_v40 = vsel %vm198_vm1, %v1334_v5, 1e+30  ;;  %vm204_vm2 = vcmask 80896   ;;  %vm754_vm3 = vcmask 74752  }
  0x4c   : > { %v239_v3 = vunpack.c.0.s8 %v238_v2  ;;  %v233_v9 = vsel %vm199_vm0, %v1343_v8, -1e+30  ;;  %v236_v49 = vcombine.high %v234_v40, %v234_v40  ;;  %v817_v6 = vand.u32 127, %v240_v0  ;;  %s1447_s13 = smov (!%p192_p7, %s1216_s13), 1 }
  0x4d   : > { %v286_v13 = vcombine.high %v233_v9, %v233_v9  ;;  %v1361_v43 = vsub.s32 0, %v1332_v4  ;;  %vm827_vm4 = vcmask 130112   ;;  %vm892_vm5 = vcmask 1041409   ;;  %s1021_s18 = sshll.u32 %s1447_s13, 3 }
  0x4e   : > { %v1339_v7 = vsub.s32 %v239_v3, %v1332_v4  ;;  %vm894_vm6 = vcmask 1042434   ;;  %vm896_vm7 = vcmask 1043459   ;;  %vm898_vm8 = vcmask 1044484   ;;  %s195_s25 = scalar_lea.vmem %s1433_s2, %s1021_s18 }
  0x4f   : > { %vm900_vm9 = vcmask 1045509   ;;  %vm902_vm10 = vcmask 1046534   ;;  %vm904_vm11 = vcmask 1047559   ;;  %vm921_vm15 = vcmask 7168  }
  0x50   : > { %v293_v10 = vrot.slane %v233_v9, %v1339_v7  ;;  %v300_v16 = vrot.slane %v286_v13, %v1339_v7  ;;  %v243_v41 = vrot.slane %v234_v40, %v1339_v7  ;;  %v250_v54 = vrot.slane %v236_v49, %v1339_v7 }
  0x52   : > { %v309_v11 = vrot.slane %v293_v10, %v1339_v7  ;;  %v301_v12 = vcombine.high %v293_v10, %v293_v10  ;;  %v302_v18 = vcombine.high %v300_v16, %v300_v16  ;;  %v316_v19 = vrot.slane %v300_v16, %v1339_v7 }
  0x53   : > { %v259_v42 = vrot.slane %v243_v41, %v1339_v7  ;;  %v251_v45 = vcombine.high %v243_v41, %v243_v41  ;;  %v266_v58 = vrot.slane %v250_v54, %v1339_v7 }
  0x54   : > { %343 = vxpose.xlu0.b32.start.end [1/1] (short) (narrow) %v309_v11, 16  ;;  %v331_v14 = vcombine.high %v309_v11, %v309_v11  ;;  %v323_v15 = vrot.slane %v301_v12, %v1339_v7  ;;  %v330_v20 = vrot.slane %v302_v18, %v1339_v7  ;;  %v332_v21 = vcombine.high %v316_v19, %v316_v19 }
  0x55   : > { %v682_v44 = vrot.slane %v259_v42, %v1361_v43  ;;  %v273_v48 = vrot.slane %v251_v45, %v1339_v7  ;;  %v281_v53 = vcombine.high %v259_v42, %v259_v42  ;;  %v698_v63 = vrot.slane %v266_v58, %v1361_v43 }
  0x56   : > { %407 = vxpose.xlu1.b32.start.end [1/1] (short) (narrow) %v331_v14, 16  ;;  %v333_v17 = vcombine.high %v323_v15, %v323_v15  ;;  %v334_v22 = vcombine.high %v330_v20, %v330_v20  ;;  %v252_v11 = vcombine.high %v250_v54, %v250_v54 }
  0x57   : > { %v686_v52 = vrot.slane %v273_v48, %v1361_v43  ;;  %v690_v57 = vrot.slane %v281_v53, %v1361_v43  ;;  %v283_v10 = vcombine.high %v273_v48, %v273_v48 }
  0x58   : > { %v280_v18 = vrot.slane %v252_v11, %v1339_v7 }
  0x59   : > { %375 = vxpose.xlu0.b32.start.end [1/1] (short) (narrow) %v323_v15, 16 }
  0x5b   : > { %439 = vxpose.xlu1.b32.start.end [1/1] (short) (narrow) %v333_v17, 16  ;;  %v694_v17 = vrot.slane %v283_v10, %v1361_v43 }
  0x5e   : > { %471 = vxpose.xlu0.b32.start.end [1/1] (short) (narrow) %v316_v19, 16 }
  0x60   : > { %503 = vxpose.xlu1.b32.start.end [1/1] (short) (narrow) %v330_v20, 16 }
  0x63   : > { %535 = vxpose.xlu0.b32.start.end [1/1] (short) (narrow) %v332_v21, 16 }
  0x65   : > { %567 = vxpose.xlu1.b32.start.end [1/1] (short) (narrow) %v334_v22, 16 }
  0x83   : > { %1074 = vset.pattern.permute.xlu1 %v1180_v23 }
  0x8c   : > { %1073 = vset.pattern.permute.xlu0 %v1180_v23  ;;  %v702_v23 = vrot.slane %v280_v18, %v1361_v43 }
  0xd0   : > { %v359_v24 = vpop.trf.xlu0 }
  0xd1   : > { %601 = vperm.xlu0 %1073, %v359_v24  }
  0xd2   : > { %v423_v25 = vpop.trf.xlu1 }
  0xd4   : > { %v360_v26 = vpop.trf.xlu0 }
  0xd6   : > { %v424_v27 = vpop.trf.xlu1 }
  0xd7   : > { %626 = vperm.xlu0 %1073, %v424_v27  }
  0xd8   : > { %v391_v28 = vpop.trf.xlu0 }
  0xd9   : > { %611 = vperm.xlu1 %1074, %v391_v28  }
  0xda   : > { %v455_v29 = vpop.trf.xlu1 }
  0xdc   : > { %v392_v30 = vpop.trf.xlu0 }
  0xdd   : > { %621 = vperm.xlu1 %1074, %v423_v25  }
  0xde   : > { %v456_v31 = vpop.trf.xlu1 }
  0xe0   : > { %v487_v32 = vpop.trf.xlu0 }
  0xe1   : > { %641 = vperm.xlu1 %1074, %v487_v32  }
  0xe2   : > { %v519_v33 = vpop.trf.xlu1 }
  0xe4   : > { %v488_v34 = vpop.trf.xlu0 }
  0xe5   : > { %646 = vperm.xlu0 %1073, %v488_v34   ;;  %606 = vperm.xlu1 %1074, %v360_v26  }
  0xe6   : > { %v520_v35 = vpop.trf.xlu1 }
  0xe8   : > { %v551_v36 = vpop.trf.xlu0 }
  0xe9   : > { %636 = vperm.xlu0 %1073, %v456_v31   ;;  %631 = vperm.xlu1 %1074, %v455_v29  }
  0xea   : > { %v583_v37 = vpop.trf.xlu1 }
  0xec   : > { %v552_v38 = vpop.trf.xlu0 }
  0xed   : > { %656 = vperm.xlu0 %1073, %v520_v35   ;;  %651 = vperm.xlu1 %1074, %v519_v33  }
  0xee   : > { %v584_v39 = vpop.trf.xlu1 }
  0xf1   : > { %666 = vperm.xlu0 %1073, %v552_v38   ;;  %616 = vperm.xlu1 %1074, %v392_v30   ;;  %v282_v30 = vcombine.high %v266_v58, %v266_v58 }
  0xf3   : > { %v706_v35 = vrot.slane %v282_v30, %v1361_v43 }
  0xf5   : > { %661 = vperm.xlu1 %1074, %v551_v36   ;;  %676 = vperm.xlu0 %1073, %v584_v39  }
  0xf9   : > { %671 = vperm.xlu1 %1074, %v583_v37   ;;  %v284_v37 = vcombine.high %v280_v18, %v280_v18 }
  0xfb   : > { %v710_v45 = vrot.slane %v284_v37, %v1361_v43 }
 0x14c   : > { %v602_v46 = vpop.permute.xlu0 %601 }
 0x14d   : > { %v719_v47 = vsub.f32 %v602_v46, %v682_v44 }
 0x14f   : > { %v735_v50 = vmax.f32 %v719_v47, 0.0 }
 0x151   : > { %v751_v51 = vsel %vm204_vm2, %v735_v50, 0.0 }
 0x152   : > { %752 = vadd.xlane.f32.xlu1 %v751_v51  ;;  %v627_v13 = vpop.permute.xlu0 %626 }
 0x153   : > { %v724_v7 = vsub.f32 %v627_v13, %v690_v57 }
 0x154   : > { %v612_v55 = vpop.permute.xlu1 %611 }
 0x155   : > { %v721_v56 = vsub.f32 %v612_v55, %v686_v52  ;;  %v740_v38 = vmax.f32 %v724_v7, 0.0  ;;  %v1181_v55 = vmov 0.0  }
 0x157   : > { %v737_v59 = vmax.f32 %v721_v56, 0.0  ;;  %v767_v49 = vsel %vm754_vm3, %v740_v38, 0.0  ;;  %v1022_v56 = vsel %vm198_vm1, 1.0, %v1181_v55 }
 0x158   : > { %v622_v60 = vpop.permute.xlu1 %621 }
 0x159   : > { %v723_v61 = vsub.f32 %v622_v60, %v690_v57  ;;  %v758_v62 = vsel %vm204_vm2, %v737_v59, 0.0  ;;  %v205_v60 = vsel %vm204_vm2, %v1022_v56, 0.0 }
 0x15a   : > { %759 = vadd.xlane.f32.xlu0 %v758_v62 }
 0x15b   : > { %v739_v1 = vmax.f32 %v723_v61, 0.0 }
 0x15c   : > { %v642_v2 = vpop.permute.xlu1 %641 }
 0x15d   : > { %v727_v3 = vsub.f32 %v642_v2, %v698_v63  ;;  %v764_v9 = vsel %vm204_vm2, %v739_v1, 0.0  ;;  %v211_v2 = vsub.f32 1.0, %v1334_v5 }
 0x15e   : > { %765 = vadd.xlane.f32.xlu0 %v764_v9 }
 0x15f   : > { %v743_v12 = vmax.f32 %v727_v3, 0.0  ;;  %v212_v3 = vmax.f32 %v211_v2, 0.0 }
 0x160   : > { %v607_v14 = vpop.permute.xlu1 %606  ;;  %v647_v24 = vpop.permute.xlu0 %646 }
 0x161   : > { %v720_v15 = vsub.f32 %v607_v14, %v682_v44  ;;  %v776_v16 = vsel %vm204_vm2, %v743_v12, 0.0  ;;  %v728_v39 = vsub.f32 %v647_v24, %v698_v63  ;;  %v213_v12 = vmul.f32 %v1022_v56, %v212_v3 }
 0x162   : > { %777 = vadd.xlane.f32.xlu0 %v776_v16  ;;  %v218_v16 = vmax.f32 %v1343_v8, 0.0 }
 0x163   : > { %v736_v19 = vmax.f32 %v720_v15, 0.0  ;;  %v744_v47 = vmax.f32 %v728_v39, 0.0  ;;  %v214_v13 = vsel %vm204_vm2, %v213_v12, 0.0 }
 0x164   : > { %v632_v20 = vpop.permute.xlu1 %631  ;;  %v637_v31 = vpop.permute.xlu0 %636 }
 0x165   : > { %v725_v21 = vsub.f32 %v632_v20, %v694_v17  ;;  %v755_v22 = vsel %vm754_vm3, %v736_v19, 0.0  ;;  %v726_v50 = vsub.f32 %v637_v31, %v694_v17  ;;  %v779_v43 = vsel %vm754_vm3, %v744_v47, 0.0 }
 0x166   : > { %756 = vadd.xlane.f32.xlu0 %v755_v22  ;;  %v1023_v17 = vsel %vm199_vm0, 1.0, %v1181_v55 }
 0x167   : > { %v741_v25 = vmax.f32 %v725_v21, 0.0  ;;  %v742_v57 = vmax.f32 %v726_v50, 0.0  ;;  %v208_v18 = vsel %vm204_vm2, %v1023_v17, 0.0  ;;  %v219_v19 = vmul.f32 %v1023_v17, %v218_v16 }
 0x168   : > { %v652_v26 = vpop.permute.xlu1 %651  ;;  %v657_v44 = vpop.permute.xlu0 %656 }
 0x169   : > { %v729_v27 = vsub.f32 %v652_v26, %v702_v23  ;;  %v770_v28 = vsel %vm204_vm2, %v741_v25, 0.0  ;;  %v730_v58 = vsub.f32 %v657_v44, %v702_v23  ;;  %v773_v63 = vsel %vm754_vm3, %v742_v57, 0.0 }
 0x16a   : > { %771 = vadd.xlane.f32.xlu0 %v770_v28  ;;  %v220_v20 = vsel %vm204_vm2, %v219_v19, 0.0  ;;  %v822_v28 = vadd.s32 4294967288, %v817_v6 }
 0x16b   : > { %v745_v29 = vmax.f32 %v729_v27, 0.0  ;;  %v746_v61 = vmax.f32 %v730_v58, 0.0 }
 0x16c   : > { %v617_v32 = vpop.permute.xlu1 %616  ;;  %v667_v54 = vpop.permute.xlu0 %666  ;;  %v825_v30 = vsub.s32 %v822_v28, %v1332_v4 }
 0x16d   : > { %v722_v33 = vsub.f32 %v617_v32, %v686_v52  ;;  %v782_v34 = vsel %vm204_vm2, %v745_v29, 0.0  ;;  %v732_v62 = vsub.f32 %v667_v54, %v706_v35  ;;  %v785_v11 = vsel %vm754_vm3, %v746_v61, 0.0 }
 0x16e   : > { %783 = vadd.xlane.f32.xlu0 %v782_v34  ;;  %v820_v32 = vsub.s32 %v817_v6, %v1332_v4 }
 0x16f   : > { %v738_v36 = vmax.f32 %v722_v33, 0.0  ;;  %v748_v9 = vmax.f32 %v732_v62, 0.0 }
 0x170   : > { %v662_v40 = vpop.permute.xlu1 %661  ;;  %v677_v1 = vpop.permute.xlu0 %676 }
 0x171   : > { %v731_v41 = vsub.f32 %v662_v40, %v706_v35  ;;  %v761_v42 = vsel %vm754_vm3, %v738_v36, 0.0  ;;  %v734_v10 = vsub.f32 %v677_v1, %v710_v45  ;;  %v791_v15 = vsel %vm754_vm3, %v748_v9, 0.0 }
 0x172   : > { %762 = vadd.xlane.f32.xlu1 %v761_v42 }
 0x173   : > { %v747_v46 = vmax.f32 %v731_v41, 0.0  ;;  %v750_v14 = vmax.f32 %v734_v10, 0.0 }
 0x174   : > { %v672_v48 = vpop.permute.xlu1 %671 }
 0x175   : > { %v733_v51 = vsub.f32 %v672_v48, %v710_v45  ;;  %v788_v52 = vsel %vm204_vm2, %v747_v46, 0.0  ;;  %v797_v5 = vsel %vm754_vm3, %v750_v14, 0.0 }
 0x176   : > { %768 = vadd.xlane.f32.xlu1 %v767_v49  ;;  %789 = vadd.xlane.f32.xlu0 %v788_v52 }
 0x177   : > { %v749_v53 = vmax.f32 %v733_v51, 0.0 }
 0x179   : > { %v794_v59 = vsel %vm204_vm2, %v749_v53, 0.0 }
 0x17a   : > { %780 = vadd.xlane.f32.xlu1 %v779_v43  ;;  %795 = vadd.xlane.f32.xlu0 %v794_v59 }
 0x17e   : > { %774 = vadd.xlane.f32.xlu1 %v773_v63  ;;  %206 = vadd.xlane.f32.xlu0 %v205_v60 }
 0x182   : > { %786 = vadd.xlane.f32.xlu1 %v785_v11  ;;  %215 = vadd.xlane.f32.xlu0 %v214_v13 }
 0x186   : > { %792 = vadd.xlane.f32.xlu1 %v791_v15 }
 0x18a   : > { %798 = vadd.xlane.f32.xlu1 %v797_v5 }
 0x18e   : > { %209 = vadd.xlane.f32.xlu1 %v208_v18 }
 0x192   : > { %221 = vadd.xlane.f32.xlu1 %v220_v20 }
 0x1db   : > { %v753_v24 = vpop.xlane.xlu1 %752 }
 0x1dc   : > { %v821_v41 = vrot.slane %v753_v24, %v820_v32 }
 0x1e3   : > { %v760_v21 = vpop.xlane.xlu0 %759 }
 0x1e4   : > { %v832_v35 = vrot.slane %v760_v21, %v820_v32 }
 0x1e7   : > { %v766_v22 = vpop.xlane.xlu0 %765 }
 0x1e8   : > { %v841_v38 = vrot.slane %v766_v22, %v820_v32 }
 0x1eb   : > { %v778_v23 = vpop.xlane.xlu0 %777 }
 0x1ec   : > { %v859_v53 = vrot.slane %v778_v23, %v820_v32 }
 0x1ef   : > { %v757_v25 = vpop.xlane.xlu0 %756 }
 0x1f0   : > { %v826_v36 = vrot.slane %v757_v25, %v825_v30 }
 0x1f2   : > { %v828_v45 = vsel %vm827_vm4, %v826_v36, %v821_v41 }
 0x1f3   : > { %v772_v27 = vpop.xlane.xlu0 %771 }
 0x1f4   : > { %v850_v0 = vrot.slane %v772_v27, %v820_v32 }
 0x1f7   : > { %v784_v7 = vpop.xlane.xlu0 %783 }
 0x1f8   : > { %v868_v50 = vrot.slane %v784_v7, %v820_v32 }
 0x1fb   : > { %v763_v26 = vpop.xlane.xlu1 %762 }
 0x1fc   : > { %v836_v33 = vrot.slane %v763_v26, %v825_v30 }
 0x1fe   : > { %v837_v42 = vsel %vm827_vm4, %v836_v33, %v832_v35 }
 0x1ff   : > { %v769_v8 = vpop.xlane.xlu1 %768  ;;  %v790_v39 = vpop.xlane.xlu0 %789  ;;  %v893_v47 = vsel %vm892_vm5, %v837_v42, %v828_v45 }
 0x200   : > { %v845_v34 = vrot.slane %v769_v8, %v825_v30  ;;  %v877_v54 = vrot.slane %v790_v39, %v820_v32 }
 0x202   : > { %v846_v44 = vsel %vm827_vm4, %v845_v34, %v841_v38 }
 0x203   : > { %v781_v29 = vpop.xlane.xlu1 %780  ;;  %v895_v51 = vsel %vm894_vm6, %v846_v44, %v893_v47  ;;  %v796_v55 = vpop.xlane.xlu0 %795 }
 0x204   : > { %v863_v48 = vrot.slane %v781_v29, %v825_v30  ;;  %v886_v60 = vrot.slane %v796_v55, %v820_v32 }
 0x206   : > { %v864_v58 = vsel %vm827_vm4, %v863_v48, %v859_v53 }
 0x207   : > { %v775_v31 = vpop.xlane.xlu1 %774  ;;  %v207_v10 = vpop.xlane.xlu0 %206 }
 0x208   : > { %v854_v37 = vrot.slane %v775_v31, %v825_v30  ;;  %v224_v11 = vmax.f32 %v207_v10, 1.0  ;;  %vm223_vm12 = vcmp.gt.f32.partialorder %v207_v10, 0.0 }
 0x20a   : > { %v855_v4 = vsel %vm827_vm4, %v854_v37, %v850_v0  ;;  %1075 = vrcp.f32 %v224_v11 }
 0x20b   : > { %v787_v40 = vpop.xlane.xlu1 %786  ;;  %v897_v56 = vsel %vm896_vm7, %v855_v4, %v895_v51  ;;  %v216_v17 = vpop.xlane.xlu0 %215 }
 0x20c   : > { %v872_v46 = vrot.slane %v787_v40, %v825_v30  ;;  %v899_v62 = vsel %vm898_vm8, %v864_v58, %v897_v56 }
 0x20e   : > { %v873_v57 = vsel %vm827_vm4, %v872_v46, %v868_v50 }
 0x20f   : > { %v793_v49 = vpop.xlane.xlu1 %792  ;;  %v901_v63 = vsel %vm900_vm9, %v873_v57, %v899_v62 }
 0x210   : > { %v881_v52 = vrot.slane %v793_v49, %v825_v30 }
 0x212   : > { %v882_v43 = vsel %vm827_vm4, %v881_v52, %v877_v54 }
 0x213   : > { %v799_v59 = vpop.xlane.xlu1 %798  ;;  %v903_v2 = vsel %vm902_vm10, %v882_v43, %v901_v63 }
 0x214   : > { %v890_v61 = vrot.slane %v799_v59, %v825_v30 }
 0x216   : > { %v891_v1 = vsel %vm827_vm4, %v890_v61, %v886_v60 }
 0x217   : > { %v905_v3 = vsel %vm904_vm11, %v891_v1, %v903_v2  ;;  %v210_v12 = vpop.xlane.xlu1 %209  ;;  %v1076_v16 = vpop.eup %1075 }
 0x218   : > { %v907_v9 = vsel %vm204_vm2, %v905_v3, 0.0  ;;  %v911_v13 = vmul.f32 %v210_v12, %v207_v10  ;;  %v229_v14 = vmax.f32 %v210_v12, 1.0  ;;  %v226_v18 = vmul.f32 %v1076_v16, %v216_v17 }
 0x219   : > { %908 = vadd.xlane.f32.xlu0 %v907_v9  ;;  %vm228_vm13 = vcmp.gt.f32.partialorder %v210_v12, 0.0 }
 0x21a   : > { %v913_v15 = vmax.f32 %v911_v13, 1.0  ;;  %1077 = vrcp.f32 %v229_v14  ;;  %v916_v22 = vsel %vm223_vm12, %v226_v18, 1.0  ;;  %vm912_vm14 = vcmp.gt.f32.partialorder %v911_v13, 0.0 }
 0x21b   : > { %v222_v19 = vpop.xlane.xlu1 %221  ;;  %v227_v27 = vsel %vm223_vm12, %v226_v18, 0.0 }
 0x21c   : > { %1079 = vrcp.f32 %v913_v15 }
 0x227   : > { %v1078_v5 = vpop.eup %1077 }
 0x228   : > { %v231_v21 = vmul.f32 %v1078_v5, %v222_v19 }
 0x229   : > { %v1080_v20 = vpop.eup %1079 }
 0x22a   : > { %v917_v25 = vsel %vm228_vm13, %v231_v21, %v916_v22  ;;  %v232_v26 = vsel %vm228_vm13, %v231_v21, 0.0 }
 0x2a2   : > { %v909_v23 = vpop.xlane.xlu0 %908 }
 0x2a3   : > { %v915_v24 = vmul.f32 %v1080_v20, %v909_v23 }
 0x2a5   : > { %v918_v8 = vsel %vm912_vm14, %v915_v24, %v917_v25 }
 0x2a6   : > { %v919_v6 = vadd.f32 %v918_v8, %v232_v26 }
 0x2a8   : > { %v920_v28 = vadd.f32 %v919_v6, %v227_v27 }
 0x2aa   : > { %922 = vst.msk [vmem:[%s195_s25] sm:$0xff] %vm921_vm15, %v920_v28 }
 0x2ab PF: > { %p15_p8 = scmp.ge.s32.totalorder %s1219_s14, 4   ;;  %s1442_s9 = smov %s1167_s10 }
 0x2ac   : > { %s1443_s10 = smov %s1171_s11  ;;  %s1444_s11 = smov %s1229_s17 }
 0x2ad   : > { %s1445_s12 = smov %s1219_s14  ;;  %17 = sbr.rel (!%p15_p8) target bundleno = 5 (0x5), region = 81 }
 0x2b2   :  { %942 = vsyncpa [#allocation3], 1 }
 0x2b3   :  { %944 = vsyncpa [#allocation3 + $0x1], 1 }
 0x2b4   :  { %945 = vsyncpa [#allocation5], 1 }
 0x2b5   :  { %947 = vsyncpa [#allocation5 + $0x1], 1 }

</bundles_post_ra>
